<compile_context>
chip_gen: v7x
topology: tpu7x:2x2x1
jax: 0.10.0
libtpu: 0.0.40
codegen_flags: <defaults>
</compile_context>

<pallas_src>
import jax
import jax.numpy as jnp
from jax.experimental import pallas as pl
from jax.experimental.pallas import tpu as pltpu


LEAKY_SLOPE = 0.01   # nn.LeakyReLU default
LN_EPS = 1e-5        # nn.LayerNorm default


def _leaky_relu(x):
    return jnp.where(x > 0, x, LEAKY_SLOPE * x)


def _round_up(x, m):
    return -(-x // m) * m


def event_type_kernel(x_ref,
                      ln_g_ref, ln_b_ref,
                      w0_ref, b0_ref,
                      w1_ref, b1_ref,
                      wf_ref, bf_ref,
                      out_ref):
    x = x_ref[...]                                          # [bm, D] f32

    # LayerNorm over the feature axis (single-pass variance: E[x^2] - mean^2)
    mean = jnp.mean(x, axis=-1, keepdims=True)
    mean_sq = jnp.mean(x * x, axis=-1, keepdims=True)
    var = mean_sq - mean * mean
    xn = (x - mean) * jax.lax.rsqrt(var + LN_EPS)
    xn = xn * ln_g_ref[...] + ln_b_ref[...]                 # gamma/beta [1, D] f32

    # fcs: (Linear -> LeakyReLU) x num_mlps, bf16 MXU operands, f32 accumulate
    h = jnp.dot(xn.astype(jnp.bfloat16), w0_ref[...],
                preferred_element_type=jnp.float32) + b0_ref[...]
    h = _leaky_relu(h)
    h = jnp.dot(h.astype(jnp.bfloat16), w1_ref[...],
                preferred_element_type=jnp.float32) + b1_ref[...]
    h = _leaky_relu(h)

    # fc_final (output columns pre-padded to a full 128-lane vreg width)
    logit = jnp.dot(h.astype(jnp.bfloat16), wf_ref[...],
                    preferred_element_type=jnp.float32) + bf_ref[...]
    out_ref[...] = logit.astype(out_ref.dtype)


def event_type_forward(token_feature, event_type_features, params, *,
                       block_rows=512):
    """token_feature: [N, 2*hidden], event_type_features: [1, embed_dim]."""
    n = token_feature.shape[0]
    role_nums = params["wf"].shape[1]
    d = token_feature.shape[1] + event_type_features.shape[1]

    # --- wrapper-side broadcast + concat (NOT inside the kernel) ------------
    evt = jnp.broadcast_to(event_type_features,
                           (n, event_type_features.shape[1]))
    x = jnp.concatenate([token_feature, evt], axis=1).astype(jnp.float32)

    # --- row tiling: pad N to a multiple of the row tile (f32 sublane = 8) --
    n8 = max(8, _round_up(n, 8))
    bm = min(block_rows, n8)
    n_pad = _round_up(n, bm)
    if n_pad != n:
        x = jnp.pad(x, ((0, n_pad - n), (0, 0)))

    # --- lane-dense output: pad role_nums up to a full 128-lane width -------
    out_cols = _round_up(max(role_nums, 128), 128)
    wf = jnp.pad(params["wf"], ((0, 0), (0, out_cols - role_nums)))
    bf = jnp.pad(params["bf"], ((0, 0), (0, out_cols - role_nums)))

    # --- bf16 weights for the MXU (biases / LN params stay f32) -------------
    w0 = params["w0"].astype(jnp.bfloat16)
    w1 = params["w1"].astype(jnp.bfloat16)
    wf = wf.astype(jnp.bfloat16)

    # weights / biases: constant index_map => VMEM-resident across grid steps
    const = lambda a: pl.BlockSpec(a.shape, lambda i: (0, 0))

    out = pl.pallas_call(
        event_type_kernel,
        out_shape=jax.ShapeDtypeStruct((n_pad, out_cols), jnp.float32),
        grid_spec=pltpu.PrefetchScalarGridSpec(
            num_scalar_prefetch=0,
            grid=(n_pad // bm,),
            in_specs=[
                pl.BlockSpec((bm, d), lambda i: (i, 0)),     # activations (tiled)
                const(params["ln_g"]), const(params["ln_b"]),
                const(w0), const(params["b0"]),
                const(w1), const(params["b1"]),
                const(wf), const(bf),
            ],
            out_specs=pl.BlockSpec((bm, out_cols), lambda i: (i, 0)),
        ),
        # row axis is independent -> shard across v7x's 2 TensorCores
        # (no-op on v5e/v6e). Tiles here are tiny; default scoped VMEM is fine.
        compiler_params=pltpu.CompilerParams(
            dimension_semantics=("parallel",)),
    )(x, params["ln_g"], params["ln_b"], w0, params["b0"],
      w1, params["b1"], wf, bf)

    return out[:n, :role_nums]


def init_params(key, in_dim, final_hidden, role_nums):
    ks = jax.random.split(key, 6)
    scale = 0.05
    return {
        "ln_g": jnp.ones((1, in_dim), jnp.float32),
        "ln_b": jnp.zeros((1, in_dim), jnp.float32),
        "w0": scale * jax.random.normal(ks[0], (in_dim, final_hidden), jnp.float32),
        "b0": scale * jax.random.normal(ks[1], (1, final_hidden), jnp.float32),
        "w1": scale * jax.random.normal(ks[2], (final_hidden, final_hidden), jnp.float32),
        "b1": scale * jax.random.normal(ks[3], (1, final_hidden), jnp.float32),
        "wf": scale * jax.random.normal(ks[4], (final_hidden, role_nums), jnp.float32),
        "bf": scale * jax.random.normal(ks[5], (1, role_nums), jnp.float32),
    }


def reference_forward(token_feature, event_type_features, params):
    """Pure-JAX f32 reference matching the PyTorch forward.

    Dropout is defined in the module but never applied in forward() -> omitted.
    """
    n = token_feature.shape[0]
    evt = jnp.broadcast_to(event_type_features,
                           (n, event_type_features.shape[1]))
    x = jnp.concatenate([token_feature, evt], axis=1)
    mean = jnp.mean(x, axis=-1, keepdims=True)
    var = jnp.var(x, axis=-1, keepdims=True)
    x = (x - mean) / jnp.sqrt(var + LN_EPS) * params["ln_g"] + params["ln_b"]
    h = _leaky_relu(x @ params["w0"] + params["b0"])
    h = _leaky_relu(h @ params["w1"] + params["b1"])
    return h @ params["wf"] + params["bf"]


if __name__ == "__main__":
    # hidden_size=32 -> 2*hidden=64, event_type_embedding_dim=64 -> in_dim=128,
    # final_hidden_size=128, num_mlps=2, role_nums=8, N=256 tokens.
    N, HID2, EMB = 256, 64, 64
    IN_DIM = HID2 + EMB
    FINAL_HID = 128
    ROLE_NUMS = 8

    key = jax.random.PRNGKey(0)
    k_tok, k_evt, k_par = jax.random.split(key, 3)
    token_feature = jax.random.normal(k_tok, (N, HID2), jnp.float32)
    event_type_features = jax.random.normal(k_evt, (1, EMB), jnp.float32)
    params = init_params(k_par, IN_DIM, FINAL_HID, ROLE_NUMS)

    # block_rows=128 -> 2-step row grid (exercises the pipelined BlockSpecs)
    out = event_type_forward(token_feature, event_type_features, params,
                             block_rows=128)
    out = jax.block_until_ready(out)

    ref = reference_forward(token_feature, event_type_features, params)
    assert out.shape == (N, ROLE_NUMS)
    # bf16 MXU operands with f32 accumulation -> loosened tolerance vs f32 ref
    assert jnp.allclose(out, ref, atol=5e-2, rtol=5e-2), "mismatch vs reference"

    print("KERNEL_OK")
</pallas_src>

<mosaic_0001>
module attributes {stable_mosaic.version = 11 : i64} {
  func.func @event_type_kernel(%arg0: i32, %arg1: memref<128x128xf32, #tpu.memory_space<vmem>>, %arg2: memref<1x128xf32, #tpu.memory_space<vmem>>, %arg3: memref<1x128xf32, #tpu.memory_space<vmem>>, %arg4: memref<128x128xbf16, #tpu.memory_space<vmem>>, %arg5: memref<1x128xf32, #tpu.memory_space<vmem>>, %arg6: memref<128x128xbf16, #tpu.memory_space<vmem>>, %arg7: memref<1x128xf32, #tpu.memory_space<vmem>>, %arg8: memref<128x128xbf16, #tpu.memory_space<vmem>>, %arg9: memref<1x128xf32, #tpu.memory_space<vmem>>, %arg10: memref<128x128xf32, #tpu.memory_space<vmem>>) attributes {dimension_semantics = [#tpu.dimension_semantics<parallel>], iteration_bounds = array<i64: 2>, scalar_prefetch = 0 : i64, scratch_operands = 0 : i64, tpu.core_type = #tpu.core_type<tc>, window_params = [{transform_indices = @transform_0, window_bounds = array<i64: 128, 128>}, {pipeline_mode = #tpu.pipeline_mode<synchronous>, transform_indices = @transform_1, window_bounds = array<i64: 1, 128>}, {pipeline_mode = #tpu.pipeline_mode<synchronous>, transform_indices = @transform_2, window_bounds = array<i64: 1, 128>}, {pipeline_mode = #tpu.pipeline_mode<synchronous>, transform_indices = @transform_3, window_bounds = array<i64: 128, 128>}, {pipeline_mode = #tpu.pipeline_mode<synchronous>, transform_indices = @transform_4, window_bounds = array<i64: 1, 128>}, {pipeline_mode = #tpu.pipeline_mode<synchronous>, transform_indices = @transform_5, window_bounds = array<i64: 128, 128>}, {pipeline_mode = #tpu.pipeline_mode<synchronous>, transform_indices = @transform_6, window_bounds = array<i64: 1, 128>}, {pipeline_mode = #tpu.pipeline_mode<synchronous>, transform_indices = @transform_7, window_bounds = array<i64: 128, 128>}, {pipeline_mode = #tpu.pipeline_mode<synchronous>, transform_indices = @transform_8, window_bounds = array<i64: 1, 128>}, {transform_indices = @transform_9, window_bounds = array<i64: 128, 128>}]} {
    %c0 = arith.constant 0 : index
    %c0_0 = arith.constant 0 : index
    %0 = vector.load %arg1[%c0, %c0_0] : memref<128x128xf32, #tpu.memory_space<vmem>>, vector<128x128xf32>
    %cst = arith.constant dense<0.000000e+00> : vector<128xf32>
    %1 = vector.multi_reduction <add>, %0, %cst [1] : vector<128x128xf32> to vector<128xf32>
    %2 = vector.shape_cast %1 : vector<128xf32> to vector<128x1xf32>
    %cst_1 = arith.constant 1.280000e+02 : f32
    %3 = vector.broadcast %cst_1 : f32 to vector<128x1xf32>
    %4 = arith.divf %2, %3 : vector<128x1xf32>
    %5 = arith.mulf %0, %0 : vector<128x128xf32>
    %cst_2 = arith.constant dense<0.000000e+00> : vector<128xf32>
    %6 = vector.multi_reduction <add>, %5, %cst_2 [1] : vector<128x128xf32> to vector<128xf32>
    %7 = vector.shape_cast %6 : vector<128xf32> to vector<128x1xf32>
    %cst_3 = arith.constant 1.280000e+02 : f32
    %8 = vector.broadcast %cst_3 : f32 to vector<128x1xf32>
    %9 = arith.divf %7, %8 : vector<128x1xf32>
    %10 = arith.mulf %4, %4 : vector<128x1xf32>
    %11 = arith.subf %9, %10 : vector<128x1xf32>
    %12 = vector.broadcast %4 : vector<128x1xf32> to vector<128x128xf32>
    %13 = arith.subf %0, %12 : vector<128x128xf32>
    %cst_4 = arith.constant 9.99999974E-6 : f32
    %14 = vector.broadcast %cst_4 : f32 to vector<128x1xf32>
    %15 = arith.addf %11, %14 : vector<128x1xf32>
    %16 = math.rsqrt %15 : vector<128x1xf32>
    %17 = vector.broadcast %16 : vector<128x1xf32> to vector<128x128xf32>
    %18 = arith.mulf %13, %17 : vector<128x128xf32>
    %c0_5 = arith.constant 0 : index
    %c0_6 = arith.constant 0 : index
    %19 = vector.load %arg2[%c0_5, %c0_6] : memref<1x128xf32, #tpu.memory_space<vmem>>, vector<1x128xf32>
    %20 = vector.broadcast %19 : vector<1x128xf32> to vector<128x128xf32>
    %21 = arith.mulf %18, %20 : vector<128x128xf32>
    %c0_7 = arith.constant 0 : index
    %c0_8 = arith.constant 0 : index
    %22 = vector.load %arg3[%c0_7, %c0_8] : memref<1x128xf32, #tpu.memory_space<vmem>>, vector<1x128xf32>
    %23 = vector.broadcast %22 : vector<1x128xf32> to vector<128x128xf32>
    %24 = arith.addf %21, %23 : vector<128x128xf32>
    %25 = arith.truncf %24 : vector<128x128xf32> to vector<128x128xbf16>
    %c0_9 = arith.constant 0 : index
    %c0_10 = arith.constant 0 : index
    %26 = vector.load %arg4[%c0_9, %c0_10] : memref<128x128xbf16, #tpu.memory_space<vmem>>, vector<128x128xbf16>
    %cst_11 = arith.constant dense<0.000000e+00> : vector<128x128xf32>
    %27 = tpu.matmul %25, %26, %cst_11 {dimension_numbers = #tpu.dot_dimension_numbers<[1], [0], [0], [1], [0, 0, 1, 1], [], []>} : vector<128x128xbf16>, vector<128x128xbf16>, vector<128x128xf32> -> vector<128x128xf32>
    %c0_12 = arith.constant 0 : index
    %c0_13 = arith.constant 0 : index
    %28 = vector.load %arg5[%c0_12, %c0_13] : memref<1x128xf32, #tpu.memory_space<vmem>>, vector<1x128xf32>
    %29 = vector.broadcast %28 : vector<1x128xf32> to vector<128x128xf32>
    %30 = arith.addf %27, %29 : vector<128x128xf32>
    %cst_14 = arith.constant 0.000000e+00 : f32
    %31 = vector.broadcast %cst_14 : f32 to vector<128x128xf32>
    %32 = arith.cmpf ogt, %30, %31 : vector<128x128xf32>
    %cst_15 = arith.constant 0.00999999977 : f32
    %33 = vector.broadcast %cst_15 : f32 to vector<128x128xf32>
    %34 = arith.mulf %33, %30 : vector<128x128xf32>
    %35 = arith.select %32, %30, %34 : vector<128x128xi1>, vector<128x128xf32>
    %36 = arith.truncf %35 : vector<128x128xf32> to vector<128x128xbf16>
    %c0_16 = arith.constant 0 : index
    %c0_17 = arith.constant 0 : index
    %37 = vector.load %arg6[%c0_16, %c0_17] : memref<128x128xbf16, #tpu.memory_space<vmem>>, vector<128x128xbf16>
    %cst_18 = arith.constant dense<0.000000e+00> : vector<128x128xf32>
    %38 = tpu.matmul %36, %37, %cst_18 {dimension_numbers = #tpu.dot_dimension_numbers<[1], [0], [0], [1], [0, 0, 1, 1], [], []>} : vector<128x128xbf16>, vector<128x128xbf16>, vector<128x128xf32> -> vector<128x128xf32>
    %c0_19 = arith.constant 0 : index
    %c0_20 = arith.constant 0 : index
    %39 = vector.load %arg7[%c0_19, %c0_20] : memref<1x128xf32, #tpu.memory_space<vmem>>, vector<1x128xf32>
    %40 = vector.broadcast %39 : vector<1x128xf32> to vector<128x128xf32>
    %41 = arith.addf %38, %40 : vector<128x128xf32>
    %cst_21 = arith.constant 0.000000e+00 : f32
    %42 = vector.broadcast %cst_21 : f32 to vector<128x128xf32>
    %43 = arith.cmpf ogt, %41, %42 : vector<128x128xf32>
    %cst_22 = arith.constant 0.00999999977 : f32
    %44 = vector.broadcast %cst_22 : f32 to vector<128x128xf32>
    %45 = arith.mulf %44, %41 : vector<128x128xf32>
    %46 = arith.select %43, %41, %45 : vector<128x128xi1>, vector<128x128xf32>
    %47 = arith.truncf %46 : vector<128x128xf32> to vector<128x128xbf16>
    %c0_23 = arith.constant 0 : index
    %c0_24 = arith.constant 0 : index
    %48 = vector.load %arg8[%c0_23, %c0_24] : memref<128x128xbf16, #tpu.memory_space<vmem>>, vector<128x128xbf16>
    %cst_25 = arith.constant dense<0.000000e+00> : vector<128x128xf32>
    %49 = tpu.matmul %47, %48, %cst_25 {dimension_numbers = #tpu.dot_dimension_numbers<[1], [0], [0], [1], [0, 0, 1, 1], [], []>} : vector<128x128xbf16>, vector<128x128xbf16>, vector<128x128xf32> -> vector<128x128xf32>
    %c0_26 = arith.constant 0 : index
    %c0_27 = arith.constant 0 : index
    %50 = vector.load %arg9[%c0_26, %c0_27] : memref<1x128xf32, #tpu.memory_space<vmem>>, vector<1x128xf32>
    %51 = vector.broadcast %50 : vector<1x128xf32> to vector<128x128xf32>
    %52 = arith.addf %49, %51 : vector<128x128xf32>
    %c0_28 = arith.constant 0 : index
    %c0_29 = arith.constant 0 : index
    %53 = vector.load %arg10[%c0_28, %c0_29] : memref<128x128xf32, #tpu.memory_space<vmem>>, vector<128x128xf32>
    tpu.vector_store %arg10[%c0_28, %c0_29], %52 {strides = array<i32>} : memref<128x128xf32, #tpu.memory_space<vmem>>, vector<128x128xf32>,
    return
  }
  func.func @transform_0(%arg0: i32) -> (i32, i32) {
    %c0_i32 = arith.constant 0 : i32
    %c0_i32_0 = arith.constant 0 : i32
    return %arg0, %c0_i32 : i32, i32
  }
  func.func @transform_1(%arg0: i32) -> (i32, i32) {
    %c0_i32 = arith.constant 0 : i32
    %c0_i32_0 = arith.constant 0 : i32
    %c0_i32_1 = arith.constant 0 : i32
    return %c0_i32, %c0_i32_0 : i32, i32
  }
  func.func @transform_2(%arg0: i32) -> (i32, i32) {
    %c0_i32 = arith.constant 0 : i32
    %c0_i32_0 = arith.constant 0 : i32
    %c0_i32_1 = arith.constant 0 : i32
    return %c0_i32, %c0_i32_0 : i32, i32
  }
  func.func @transform_3(%arg0: i32) -> (i32, i32) {
    %c0_i32 = arith.constant 0 : i32
    %c0_i32_0 = arith.constant 0 : i32
    %c0_i32_1 = arith.constant 0 : i32
    return %c0_i32, %c0_i32_0 : i32, i32
  }
  func.func @transform_4(%arg0: i32) -> (i32, i32) {
    %c0_i32 = arith.constant 0 : i32
    %c0_i32_0 = arith.constant 0 : i32
    %c0_i32_1 = arith.constant 0 : i32
    return %c0_i32, %c0_i32_0 : i32, i32
  }
  func.func @transform_5(%arg0: i32) -> (i32, i32) {
    %c0_i32 = arith.constant 0 : i32
    %c0_i32_0 = arith.constant 0 : i32
    %c0_i32_1 = arith.constant 0 : i32
    return %c0_i32, %c0_i32_0 : i32, i32
  }
  func.func @transform_6(%arg0: i32) -> (i32, i32) {
    %c0_i32 = arith.constant 0 : i32
    %c0_i32_0 = arith.constant 0 : i32
    %c0_i32_1 = arith.constant 0 : i32
    return %c0_i32, %c0_i32_0 : i32, i32
  }
  func.func @transform_7(%arg0: i32) -> (i32, i32) {
    %c0_i32 = arith.constant 0 : i32
    %c0_i32_0 = arith.constant 0 : i32
    %c0_i32_1 = arith.constant 0 : i32
    return %c0_i32, %c0_i32_0 : i32, i32
  }
  func.func @transform_8(%arg0: i32) -> (i32, i32) {
    %c0_i32 = arith.constant 0 : i32
    %c0_i32_0 = arith.constant 0 : i32
    %c0_i32_1 = arith.constant 0 : i32
    return %c0_i32, %c0_i32_0 : i32, i32
  }
  func.func @transform_9(%arg0: i32) -> (i32, i32) {
    %c0_i32 = arith.constant 0 : i32
    %c0_i32_0 = arith.constant 0 : i32
    return %arg0, %c0_i32 : i32, i32
  }
}

</mosaic_0001>

<bundles_post_ra>
// kernel: tpu_custom_call.1
= control target key start
LH: loop header
LB: loop body
LE: loop exit
PB: predicated region body
PF: predicated region fallthrough
CT: control target
= control target key end

     0   :  { %s2578_s0 = inlined_call_operand.hbm [shape: f32[256,128], index: 0, kind: input, shape index: {}]   ;;  %s2579_s1 = inlined_call_operand.vmem [shape: f32[1,128], index: 1, kind: input, shape index: {}]   ;;  %s2580_s2 = inlined_call_operand.vmem [shape: f32[1,128], index: 2, kind: input, shape index: {}]   ;;  %s2581_s3 = inlined_call_operand.hbm [shape: bf16[128,128], index: 3, kind: input, shape index: {}]   ;;  %s2582_s4 = inlined_call_operand.vmem [shape: f32[1,128], index: 4, kind: input, shape index: {}]   ;;  %s2583_s5 = inlined_call_operand.hbm [shape: bf16[128,128], index: 5, kind: input, shape index: {}]   ;;  %s2584_s6 = inlined_call_operand.vmem [shape: f32[1,128], index: 6, kind: input, shape index: {}]   ;;  %s2585_s7 = inlined_call_operand.hbm [shape: bf16[128,128], index: 7, kind: input, shape index: {}]   ;;  %s2586_s8 = inlined_call_operand.vmem [shape: f32[1,128], index: 8, kind: input, shape index: {}]   ;;  %s2587_s9 = inlined_call_operand.hbm [shape: f32[256,128], index: 9, kind: output, shape index: {}]  }
   0x1   :  { %2594 = sst [smem:[#allocation17_spill]] %s2587_s9 }
   0x2   :  { %14 = vsyncpa [#allocation3], 0 }
   0x3   :  { %16 = vsyncpa [#allocation3 + $0x1], 0 }
   0x4   :  { %17 = vsyncpa [#allocation6], 0 }
   0x5   :  { %18 = vsyncpa [#allocation9], 0 }
   0x6   :  { %19 = vsyncpa [#allocation4], 0 }
   0x7   :  { %21 = vsyncpa [#allocation4 + $0x1], 0  ;;  %s2026_s30 = smov 0   ;;  %s2028_s10 = smov 0  }
   0x8   :  { %s2030_s11 = smov 0   ;;  %s2032_s12 = smov 0  }
   0x9 LB: > { %2595 = sst [smem:[#allocation15_spill]] %s1951_s30  ;;  %s2047_s13 = sadd.s32 4294967295, %s1963_s12   ;;  %s1963_s12 = sphi %s2032_s12, %s2619_s12   ;;  %s1959_s11 = sphi %s2030_s11, %s2618_s11   ;;  %s1955_s10 = sphi %s2028_s10, %s2617_s10   ;;  %s1951_s30 = sphi %s2026_s30, %s2616_s30  }
   0xa   : > { %s1425_s14 = sadd.s32 4294967294, %s1963_s12   ;;  %p47_p0 = scmp.ne.s32.totalorder %s1955_s10, %s1951_s30 }
   0xb   : > { %p2588_p1 = scmp.eq.s32.totalorder %s2047_s13, 0  ;;  %p245_p3 = scmp.eq.s32.totalorder %s1425_s14, 1 }
   0xc   : > { %p1426_p5 = scmp.ge.s32.totalorder %s1963_s12, 1  ;;  %p252_p7 = scmp.lt.s32.totalorder %s1963_s12, 3 }
   0xd   : > { %p2056_p4 = por %p2588_p1, %p47_p0  ;;  %p2061_p6 = por %p245_p3, %p47_p0 }
   0xe   : > { %p2066_p8 = pnand %p1426_p5, %p252_p7  ;;  %s1965_s18 = smov [#allocation5]  }
   0xf   : > { %s2596_s15 = scalar_select %p2056_p4, 1, 0 }
  0x10   : > { %s2597_s16 = scalar_select %p2061_p6, 1, 0 }
  0x11   : > { %s2599_s17 = scalar_select %p2066_p8, 1, 0 }
  0x12   : > { %2598 = sst [smem:[#allocation16_spill]] %s2597_s16  ;;  %s270_s19 = sshll.u32 %s1965_s18, 4  ;;  %s2070_s19 = int_to_ptr.vmem [resolvable:$true] %s270_s19 }
  0x13   : > { %p1652_p9 = pneg %p2066_p8  ;;  %s1966_s21 = smov [#allocation7]  }
  0x14   : > { %s286_s22 = sshll.u32 %s1966_s21, 4  ;;  %s1967_s23 = smov [#allocation8]   ;;  %s2081_s22 = int_to_ptr.vmem [resolvable:$true] %s286_s22 }
  0x15   : > { %p2077_p11 = pnand %p1652_p9, %p2588_p1  ;;  %s2083_s24 = sshll.u32 %s1967_s23, 4  ;;  %s303_s24 = int_to_ptr.vmem [resolvable:$true] %s2083_s24 }
  0x16   : > { %s1775_s27 = scalar_lea.hbm %s2581_s3, 1024 }
  0x17   : > { %p1776_p12 = scmp.ne.s32.totalorder %s2581_s3, %s1775_s27  ;;  %p2093_p13 = pneg %p2077_p11 }
  0x18   : > { %p1782_p5 = scmp.lt.u32.totalorder %s1775_s27, %s2581_s3 }
  0x19   : > { %p1778_p0 = pnand %p2093_p13, %p1776_p12 }
  0x1b   : > { %p1779_p3 = pneg %p1778_p0 }
  0x1d   : > { %p1784_p7 = pnand %p1782_p5, %p1779_p3 }
  0x1f   : > { %1787 = shalt.err (!%p1784_p7)
}
  0x20   : > { %s1788_s23 = scalar_lea.vmem %s2070_s19, 1024  ;;  %p1796_p2 = scmp.lt.s32.totalorder %s2070_s19, %s2070_s19 }
  0x21   : > { %p1789_p9 = scmp.ne.s32.totalorder %s2070_s19, %s1788_s23  ;;  %p1797_p6 = scmp.lt.s32.totalorder %s1788_s23, %s1788_s23 }
  0x23   : > { %p1791_p10 = pnand %p1789_p9, %p2093_p13  ;;  %p1798_p12 = por %p1797_p6, %p1796_p2 }
  0x25   : > { %p1792_p1 = pneg %p1791_p10 }
  0x27   : > { %p1799_p0 = pnand %p1798_p12, %p1792_p1 }
  0x29   : > { %1802 = shalt.err (!%p1799_p0)
}
  0x2a   : > { %s1968_s25 = smov 64   ;;  %s1969_s26 = smov 4  }
  0x2b   : > { %1655 = dma.hbm_to_vmem [thread:$0]  (!%p2077_p11), %s2581_s3, 1024, %s2070_s19, [#allocation6], %s1968_s25, %s1968_s25, %s1969_s26  }
  0x2c   : > { %s1803_s21 = scalar_lea.hbm %s2583_s5, 1024 }
  0x2d   : > { %p1804_p1 = scmp.ne.s32.totalorder %s2583_s5, %s1803_s21  ;;  %p1810_p10 = scmp.lt.u32.totalorder %s1803_s21, %s2583_s5 }
  0x2f   : > { %p1806_p2 = pnand %p1804_p1, %p2093_p13 }
  0x31   : > { %p1807_p6 = pneg %p1806_p2 }
  0x33   : > { %p1812_p3 = pnand %p1810_p10, %p1807_p6 }
  0x35   : > { %1815 = shalt.err (!%p1812_p3)
}
  0x36   : > { %s1816_s19 = scalar_lea.vmem %s2081_s22, 1024  ;;  %p1824_p12 = scmp.lt.s32.totalorder %s2081_s22, %s2081_s22 }
  0x37   : > { %p1817_p5 = scmp.ne.s32.totalorder %s2081_s22, %s1816_s19  ;;  %p1825_p0 = scmp.lt.s32.totalorder %s1816_s19, %s1816_s19 }
  0x39   : > { %p1819_p7 = pnand %p1817_p5, %p2093_p13  ;;  %p1826_p1 = por %p1825_p0, %p1824_p12 }
  0x3b   : > { %p1820_p9 = pneg %p1819_p7 }
  0x3d   : > { %p1827_p2 = pnand %p1826_p1, %p1820_p9 }
  0x3f   : > { %1830 = shalt.err (!%p1827_p2)
}
  0x40   : > { %1658 = dma.hbm_to_vmem [thread:$0]  (!%p2077_p11), %s2583_s5, 1024, %s2081_s22, [#allocation6], %s1968_s25, %s1968_s25, %s1969_s26  }
  0x41   : > { %s1831_s28 = scalar_lea.hbm %s2585_s7, 1024 }
  0x42   : > { %p1832_p6 = scmp.ne.s32.totalorder %s2585_s7, %s1831_s28  ;;  %p1838_p5 = scmp.lt.u32.totalorder %s1831_s28, %s2585_s7 }
  0x44   : > { %p1834_p10 = pnand %p1832_p6, %p2093_p13 }
  0x46   : > { %p1835_p3 = pneg %p1834_p10 }
  0x48   : > { %p1840_p7 = pnand %p1838_p5, %p1835_p3 }
  0x4a   : > { %1843 = shalt.err (!%p1840_p7)
}
  0x4b   : > { %s1844_s19 = scalar_lea.vmem %s303_s24, 1024  ;;  %p1852_p1 = scmp.lt.s32.totalorder %s303_s24, %s303_s24 }
  0x4c   : > { %p1845_p9 = scmp.ne.s32.totalorder %s303_s24, %s1844_s19  ;;  %p1853_p2 = scmp.lt.s32.totalorder %s1844_s19, %s1844_s19 }
  0x4e   : > { %p1847_p12 = pnand %p1845_p9, %p2093_p13  ;;  %p1854_p4 = por %p1853_p2, %p1852_p1 }
  0x50   : > { %p1848_p0 = pneg %p1847_p12 }
  0x52   : > { %p1855_p8 = pnand %p1854_p4, %p1848_p0 }
  0x54   : > { %1858 = shalt.err (!%p1855_p8)
}
  0x55   : > { %1661 = dma.hbm_to_vmem [thread:$0]  (!%p2077_p11), %s2585_s7, 1024, %s303_s24, [#allocation9], %s1968_s25, %s1968_s25, %s1969_s26  }
  0x56   : > { %s2166_s14 = sadd.s32 1, %s1963_s12   ;;  %s34_s30 = sadd.s32 1, %s1959_s11 }
  0x57   : > { %s31_s20 = ssub.s32 %s1963_s12, %s2166_s14  ;;  %p41_p8 = scmp.ne.s32.totalorder %s1959_s11, %s1955_s10 }
  0x58   : > { %p32_p4 = scmp.eq.s32.totalorder %s31_s20, 0  ;;  %p42_p13 = scmp.eq.s32.totalorder %s1963_s12, 0 }
  0x59   : > { %p1673_p6 = scmp.lt.s32.totalorder %s1963_s12, 2  ;;  %p2602_p3 = scmp.eq.s32.totalorder %s2047_s13, 1 }
  0x5a   : > { %s2176_s16 = scalar_select %p32_p4, %s1959_s11, %s34_s30  }
  0x5b   : > { %p43_p10 = por %p42_p13, %p41_p8  ;;  %p2180_p5 = por %p2602_p3, %p41_p8 }
  0x5c   : > { %s319_s28 = sand.u32 1, %s1959_s11   ;;  %s1474_s29 = sshll.u32 %s1963_s12, 11 }
  0x5d   : > { %s1431_s24 = sshll.u32 %s319_s28, 7  ;;  %s2189_s18 = scalar_lea.hbm %s2578_s0, %s1474_s29 }
  0x5e   : > { %s323_s21 = scalar_lea.vmem [#allocation2], %s1431_s24  ;;  %p2191_p11 = pnand %p1673_p6, %p43_p10 }
  0x5f   : > { %s330_s23 = sshll.u32 %s323_s21, 4  ;;  %s2197_s22 = scalar_lea.sflag [#allocation3], %s319_s28  ;;  %s2195_s23 = int_to_ptr.vmem [resolvable:$true] %s330_s23 }
  0x60   : > { %s1859_s9 = scalar_lea.hbm %s2189_s18, 2048  ;;  %p1861_p9 = pneg %p2191_p11 }
  0x61   : > { %p1860_p7 = scmp.ne.s32.totalorder %s2189_s18, %s1859_s9  ;;  %s1864_s29 = scalar_lea.hbm %s2578_s0, 4096 }
  0x62   : > { %p1865_p1 = scmp.lt.u32.totalorder %s2189_s18, %s2578_s0  ;;  %p1866_p2 = scmp.lt.u32.totalorder %s1864_s29, %s1859_s9 }
  0x63   : > { %p1862_p12 = pnand %p1861_p9, %p1860_p7  ;;  %p1868_p8 = scmp.lt.u32.totalorder %s1859_s9, %s2189_s18 }
  0x64   : > { %p1867_p4 = por %p1866_p2, %p1865_p1 }
  0x65   : > { %p1863_p0 = pneg %p1862_p12 }
  0x66   : > { %p1869_p13 = por %p1868_p8, %p1867_p4 }
  0x68   : > { %p1870_p6 = pnand %p1869_p13, %p1863_p0 }
  0x6a   : > { %1873 = shalt.err (!%p1870_p6)
}
  0x6b   : > { %s1874_s28 = scalar_lea.vmem %s2195_s23, 2048  ;;  %s1970_s26 = smov [#allocation2]  }
  0x6c   : > { %p1875_p10 = scmp.ne.s32.totalorder %s2195_s23, %s1874_s28  ;;  %s1879_s21 = sshll.u32 %s1970_s26, 4  ;;  %s1880_s21 = int_to_ptr.vmem [resolvable:$false] %s1879_s21 }
  0x6d   : > { %s1881_s20 = scalar_lea.vmem %s1880_s21, 4096  ;;  %p1882_p12 = scmp.lt.s32.totalorder %s2195_s23, %s1880_s21 }
  0x6e   : > { %p1877_p3 = pnand %p1875_p10, %p1861_p9  ;;  %p1883_p1 = scmp.lt.s32.totalorder %s1881_s20, %s1874_s28 }
  0x70   : > { %p1878_p7 = pneg %p1877_p3  ;;  %p1884_p2 = por %p1883_p1, %p1882_p12 }
  0x72   : > { %p1885_p4 = pnand %p1884_p2, %p1878_p7 }
  0x74   : > { %1888 = shalt.err (!%p1885_p4)
}
  0x75   : > { %s1971_s9 = smov 128   ;;  %s1972_s30 = smov 8  }
  0x76   : > { %1665 = dma.hbm_to_vmem [thread:$0]  (!%p2191_p11), %s2189_s18, 2048, %s2195_s23, %s2197_s22, %s1971_s9, %s1971_s9, %s1972_s30  }
  0x77   : > { %p2605_p9 = scmp.ne.s32.totalorder %s2599_s17, 0 }
  0x78   : > { %s2228_s29 = sand.u32 (!%p2605_p9), 1, %s1955_s10   ;;  %p2606_p0 = scmp.ne.s32.totalorder (!%p2605_p9), %s2596_s15, 0 }
  0x79   : > { %342 = sbr.rel (%p2605_p9) target bundleno = 1043 (0x413), region = 56  ;;  %s1435_s24 = sshll.u32 (!%p2605_p9), %s2228_s29, 7 }
  0x7a   : > { %s345_s25 = scalar_lea.sflag (!%p2605_p9), [#allocation3], %s2228_s29  ;;  %s2234_s28 = scalar_lea.vmem (!%p2605_p9), [#allocation2], %s1435_s24 }
  0x80   : > { %1934 = dma.done.wait (%p2606_p0), %s345_s25, 2048  }
  0x81   : > { %1936 = vsyncadd (%p2606_p0), %s345_s25, 4294965248  ;;  %p2607_p11 = scmp.eq.s32.totalorder %s2047_s13, 0 }
  0x83   : > { %1938 = dma.done.wait (%p2607_p11), [#allocation6], 2048   ;;  %p2608_p8 = pmov %p2607_p11 }
  0x85   : > { %1940 = vsyncadd (%p2608_p8), [#allocation6], 4294965248  ;;  %p2609_p13 = pmov %p2608_p8 }
  0x86   : > { %p2610_p6 = pmov %p2608_p8 }
  0x87   : > { %1942 = dma.done.wait (%p2609_p13), [#allocation9], 1024  }
  0x88   : > { %1944 = vsyncadd (%p2610_p6), [#allocation9], 4294966272  ;;  %v2249_v0 = vld [vmem:[%s2234_s28 + $0x10] sm:$0xff]  ;;  %v2252_v1 = vld [vmem:[%s2234_s28] sm:$0xff]  ;;  %s2509_s30 = scalar_lea.vmem [#allocation10], %s1435_s24  ;;  %s1475_s24 = sshll.u32 %s2047_s13, 11 }
  0x89   : > { %418 = vadd.xlane.f32.xlu1 %v2249_v0  ;;  %414 = vadd.xlane.f32.xlu0 %v2252_v1  ;;  %v2257_v2 = vld [vmem:[%s2234_s28 + $0x18] sm:$0xff]  ;;  %v2260_v3 = vld [vmem:[%s2234_s28 + $0x8] sm:$0xff]  ;;  %v463_v5 = vmul.f32 %v2252_v1, %v2252_v1  ;;  %v465_v7 = vmul.f32 %v2249_v0, %v2249_v0  ;;  %v2276_v9 = vld [vmem:[%s2234_s28 + $0x20] sm:$0xff]  ;;  %s1323_s25 = sshll.u32 %s2509_s30, 4  ;;  %s2611_s17 = sld [smem:[#allocation17_spill]]  ;;  %s2531_s25 = int_to_ptr.vmem [resolvable:$true] %s1323_s25 }
  0x8a   : > { %v464_v4 = vmul.f32 %v2260_v3, %v2260_v3  ;;  %v466_v6 = vmul.f32 %v2257_v2, %v2257_v2  ;;  %v2273_v8 = vld [vmem:[%s2234_s28 + $0x28] sm:$0xff]  ;;  %v2279_v10 = vld [vmem:[%s2234_s28 + $0x38] sm:$0xff]  ;;  %v2282_v11 = vld [vmem:[%s2234_s28 + $0x30] sm:$0xff]  ;;  %v467_v14 = vmul.f32 %v2276_v9, %v2276_v9  ;;  %s1310_s13 = scalar_lea.sflag [#allocation4], %s2228_s29  ;;  %s1889_s23 = scalar_lea.vmem %s2531_s25, 2048 }
  0x8b   : > { %v1719_v12 = vld [vmem:[#allocation5] sm:$0xff]   ;;  %v468_v13 = vmul.f32 %v2273_v8, %v2273_v8  ;;  %v1720_v15 = vld [vmem:[#allocation5 + $0x8] sm:$0xff]   ;;  %v470_v16 = vmul.f32 %v2279_v10, %v2279_v10  ;;  %v469_v17 = vmul.f32 %v2282_v11, %v2282_v11  ;;  %v1721_v18 = vld [vmem:[#allocation5 + $0x10] sm:$0xff]   ;;  %p1890_p10 = scmp.ne.s32.totalorder %s2531_s25, %s1889_s23  ;;  %s1973_s19 = smov [#allocation10]  }
  0x8c   : > { %1524 = vmatprep.subr.bf16.mxu0 %v1719_v12  ;;  %v2297_v19 = vld [vmem:[%s2234_s28 + $0x48] sm:$0xff]  ;;  %v2300_v20 = vld [vmem:[%s2234_s28 + $0x40] sm:$0xff]  ;;  %v1722_v21 = vld [vmem:[#allocation5 + $0x18] sm:$0xff]   ;;  %s1893_s22 = sshll.u32 %s1973_s19, 4  ;;  %s1894_s22 = int_to_ptr.vmem [resolvable:$false] %s1893_s22 }
  0x8d   : > { %420 = vadd.xlane.f32.xlu1 %v2257_v2  ;;  %416 = vadd.xlane.f32.xlu0 %v2260_v3  ;;  %v2305_v22 = vld [vmem:[%s2234_s28 + $0x58] sm:$0xff]  ;;  %v2308_v23 = vld [vmem:[%s2234_s28 + $0x50] sm:$0xff]  ;;  %v1723_v24 = vld [vmem:[#allocation5 + $0x20] sm:$0xff]   ;;  %v472_v25 = vmul.f32 %v2297_v19, %v2297_v19  ;;  %v471_v26 = vmul.f32 %v2300_v20, %v2300_v20  ;;  %p1891_p3 = pnand %p1890_p10, %p2180_p5  ;;  %s1895_s26 = scalar_lea.vmem %s1894_s22, 4096 }
  0x8e   : > { %1525 = vmatpush3.bf16.msra.mxu0 %v1719_v12  ;;  %v1724_v27 = vld [vmem:[#allocation5 + $0x28] sm:$0xff]   ;;  %v474_v28 = vmul.f32 %v2305_v22, %v2305_v22  ;;  %v473_v29 = vmul.f32 %v2308_v23, %v2308_v23  ;;  %v1725_v30 = vld [vmem:[#allocation5 + $0x30] sm:$0xff]   ;;  %v2324_v32 = vld [vmem:[%s2234_s28 + $0x60] sm:$0xff]  ;;  %p1896_p12 = scmp.lt.s32.totalorder %s2531_s25, %s1894_s22  ;;  %p1897_p1 = scmp.lt.s32.totalorder %s1895_s26, %s1889_s23 }
  0x8f   : > { %1526 = vmatprep.subr.bf16.mxu0 %v1720_v15  ;;  %v2321_v31 = vld [vmem:[%s2234_s28 + $0x68] sm:$0xff]  ;;  %v1726_v33 = vld [vmem:[#allocation5 + $0x38] sm:$0xff]   ;;  %v2332_v35 = vld [vmem:[%s2234_s28 + $0x70] sm:$0xff]  ;;  %v475_v37 = vmul.f32 %v2324_v32, %v2324_v32  ;;  %s2529_s18 = scalar_lea.hbm %s2611_s17, %s1475_s24  ;;  %p1892_p7 = pneg %p1891_p3 }
  0x90   : > { %v2329_v34 = vld [vmem:[%s2234_s28 + $0x78] sm:$0xff]  ;;  %v476_v36 = vmul.f32 %v2321_v31, %v2321_v31  ;;  %v477_v39 = vmul.f32 %v2332_v35, %v2332_v35  ;;  %v1727_v40 = vld [vmem:[#allocation7] sm:$0xff]   ;;  %v1728_v41 = vld [vmem:[#allocation7 + $0x8] sm:$0xff]   ;;  %p1898_p2 = por %p1897_p1, %p1896_p12 }
  0x91   : > { %481 = vadd.xlane.f32.xlu1 %v464_v4  ;;  %479 = vadd.xlane.f32.xlu0 %v463_v5  ;;  %v478_v38 = vmul.f32 %v2329_v34, %v2329_v34  ;;  %v1729_v42 = vld [vmem:[#allocation7 + $0x10] sm:$0xff]   ;;  %v1730_v43 = vld [vmem:[#allocation7 + $0x18] sm:$0xff]   ;;  %v1731_v44 = vld [vmem:[#allocation7 + $0x20] sm:$0xff]  }
  0x92   : > { %1527 = vmatpush3.bf16.msra.mxu0 %v1720_v15  ;;  %1556 = vmatprep.subr.bf16.mxu1 %v1727_v40  ;;  %p1899_p4 = pnand %p1898_p2, %p1892_p7 }
  0x93   : > { %1528 = vmatprep.subr.bf16.mxu0 %v1721_v18  ;;  %1557 = vmatpush3.bf16.msra.mxu1 %v1727_v40 }
  0x94   : > { %1558 = vmatprep.subr.bf16.mxu1 %v1728_v41 }
  0x95   : > { %485 = vadd.xlane.f32.xlu1 %v466_v6  ;;  %483 = vadd.xlane.f32.xlu0 %v465_v7 }
  0x96   : > { %1529 = vmatpush3.bf16.msra.mxu0 %v1721_v18 }
  0x97   : > { %1530 = vmatprep.subr.bf16.mxu0 %v1722_v21  ;;  %1559 = vmatpush3.bf16.msra.mxu1 %v1728_v41 }
  0x98   : > { %1560 = vmatprep.subr.bf16.mxu1 %v1729_v42 }
  0x99   : > { %424 = vadd.xlane.f32.xlu1 %v2273_v8  ;;  %422 = vadd.xlane.f32.xlu0 %v2276_v9 }
  0x9a   : > { %1531 = vmatpush3.bf16.msra.mxu0 %v1722_v21 }
  0x9b   : > { %1532 = vmatprep.subr.bf16.mxu0 %v1723_v24  ;;  %1561 = vmatpush3.bf16.msra.mxu1 %v1729_v42 }
  0x9c   : > { %1562 = vmatprep.subr.bf16.mxu1 %v1730_v43 }
  0x9d   : > { %428 = vadd.xlane.f32.xlu1 %v2279_v10  ;;  %426 = vadd.xlane.f32.xlu0 %v2282_v11 }
  0x9e   : > { %1533 = vmatpush3.bf16.msra.mxu0 %v1723_v24 }
  0x9f   : > { %1534 = vmatprep.subr.bf16.mxu0 %v1724_v27  ;;  %1563 = vmatpush3.bf16.msra.mxu1 %v1730_v43 }
  0xa0   : > { %1564 = vmatprep.subr.bf16.mxu1 %v1731_v44 }
  0xa1   : > { %489 = vadd.xlane.f32.xlu1 %v468_v13  ;;  %487 = vadd.xlane.f32.xlu0 %v467_v14 }
  0xa2   : > { %1535 = vmatpush3.bf16.msra.mxu0 %v1724_v27 }
  0xa3   : > { %1536 = vmatprep.subr.bf16.mxu0 %v1725_v30  ;;  %1565 = vmatpush3.bf16.msra.mxu1 %v1731_v44 }
  0xa5   : > { %493 = vadd.xlane.f32.xlu1 %v470_v16  ;;  %491 = vadd.xlane.f32.xlu0 %v469_v17 }
  0xa6   : > { %1537 = vmatpush3.bf16.msra.mxu0 %v1725_v30 }
  0xa7   : > { %1538 = vmatprep.subr.bf16.mxu0 %v1726_v33 }
  0xa9   : > { %432 = vadd.xlane.f32.xlu1 %v2297_v19  ;;  %430 = vadd.xlane.f32.xlu0 %v2300_v20 }
  0xaa   : > { %1539 = vmatpush3.bf16.msra.mxu0 %v1726_v33 }
  0xad   : > { %436 = vadd.xlane.f32.xlu1 %v2305_v22  ;;  %434 = vadd.xlane.f32.xlu0 %v2308_v23 }
  0xb1   : > { %497 = vadd.xlane.f32.xlu1 %v472_v25  ;;  %495 = vadd.xlane.f32.xlu0 %v471_v26 }
  0xb5   : > { %501 = vadd.xlane.f32.xlu1 %v474_v28  ;;  %499 = vadd.xlane.f32.xlu0 %v473_v29 }
  0xb9   : > { %440 = vadd.xlane.f32.xlu1 %v2321_v31  ;;  %438 = vadd.xlane.f32.xlu0 %v2324_v32 }
  0xbd   : > { %444 = vadd.xlane.f32.xlu1 %v2329_v34  ;;  %442 = vadd.xlane.f32.xlu0 %v2332_v35 }
  0xc1   : > { %505 = vadd.xlane.f32.xlu1 %v476_v36  ;;  %503 = vadd.xlane.f32.xlu0 %v475_v37 }
  0xc5   : > { %509 = vadd.xlane.f32.xlu1 %v478_v38  ;;  %507 = vadd.xlane.f32.xlu0 %v477_v39 }
 0x116   : > { %v419_v45 = vpop.xlane.xlu1 %418  ;;  %v415_v46 = vpop.xlane.xlu0 %414 }
 0x117   : > { %v447_v49 = vmul.f32 0.0078125, %v415_v46  ;;  %v2344_v51 = vmul.f32 0.0078125, %v419_v45 }
 0x119   : > { %v527_v55 = vmul.f32 %v447_v49, %v447_v49  ;;  %v529_v61 = vmul.f32 %v2344_v51, %v2344_v51  ;;  %v559_v27 = vsub.f32 %v2252_v1, %v447_v49  ;;  %v2369_v1 = vld [vmem:[%s2579_s1] ss:$0 sm:$0xff]  ;;  %v561_v43 = vsub.f32 %v2249_v0, %v2344_v51 }
 0x11a   : > { %v421_v47 = vpop.xlane.xlu1 %420  ;;  %v417_v48 = vpop.xlane.xlu0 %416 }
 0x11b   : > { %v448_v50 = vmul.f32 0.0078125, %v417_v48  ;;  %v2346_v52 = vmul.f32 0.0078125, %v421_v47  ;;  %v2376_v47 = vld [vmem:[%s2580_s2] ss:$0 sm:$0xff] }
 0x11d   : > { %v528_v56 = vmul.f32 %v448_v50, %v448_v50  ;;  %v530_v62 = vmul.f32 %v2346_v52, %v2346_v52  ;;  %v560_v28 = vsub.f32 %v2260_v3, %v448_v50  ;;  %v562_v48 = vsub.f32 %v2257_v2, %v2346_v52 }
 0x11e   : > { %v482_v53 = vpop.xlane.xlu1 %481  ;;  %v480_v54 = vpop.xlane.xlu0 %479 }
 0x11f   : > { %v512_v57 = vmul.f32 0.0078125, %v482_v53  ;;  %v511_v58 = vmul.f32 0.0078125, %v480_v54 }
 0x121   : > { %v544_v59 = vsub.f32 %v512_v57, %v528_v56  ;;  %v543_v60 = vsub.f32 %v511_v58, %v527_v55 }
 0x122   : > { %v486_v63 = vpop.xlane.xlu1 %485  ;;  %v484_v4 = vpop.xlane.xlu0 %483 }
 0x123   : > { %v576_v5 = vadd.f32 1e-05, %v544_v59  ;;  %v575_v6 = vadd.f32 1e-05, %v543_v60  ;;  %v514_v7 = vmul.f32 0.0078125, %v486_v63  ;;  %v513_v12 = vmul.f32 0.0078125, %v484_v4 }
 0x125   : > { %1743 = vrsqrt.f32 %v576_v5  ;;  %v546_v13 = vsub.f32 %v514_v7, %v530_v62  ;;  %v545_v14 = vsub.f32 %v513_v12, %v529_v61 }
 0x126   : > { %1745 = vrsqrt.f32 %v575_v6  ;;  %v425_v15 = vpop.xlane.xlu1 %424  ;;  %v423_v16 = vpop.xlane.xlu0 %422 }
 0x127   : > { %v578_v17 = vadd.f32 1e-05, %v546_v13  ;;  %v577_v18 = vadd.f32 1e-05, %v545_v14  ;;  %v2352_v25 = vmul.f32 0.0078125, %v425_v15  ;;  %v2354_v26 = vmul.f32 0.0078125, %v423_v16 }
 0x129   : > { %1747 = vrsqrt.f32 %v578_v17  ;;  %v532_v38 = vmul.f32 %v2352_v25, %v2352_v25  ;;  %v531_v39 = vmul.f32 %v2354_v26, %v2354_v26 }
 0x12a   : > { %1749 = vrsqrt.f32 %v577_v18  ;;  %v429_v21 = vpop.xlane.xlu1 %428  ;;  %v427_v24 = vpop.xlane.xlu0 %426 }
 0x12b   : > { %v2358_v29 = vmul.f32 0.0078125, %v429_v21  ;;  %v2360_v30 = vmul.f32 0.0078125, %v427_v24 }
 0x12d   : > { %v534_v49 = vmul.f32 %v2358_v29, %v2358_v29  ;;  %v533_v50 = vmul.f32 %v2360_v30, %v2360_v30 }
 0x12e   : > { %v490_v33 = vpop.xlane.xlu1 %489  ;;  %v488_v36 = vpop.xlane.xlu0 %487 }
 0x12f   : > { %v1744_v37 = vpop.eup %1743  ;;  %v516_v40 = vmul.f32 0.0078125, %v490_v33  ;;  %v515_v41 = vmul.f32 0.0078125, %v488_v36  ;;  %v564_v33 = vsub.f32 %v2273_v8, %v2352_v25  ;;  %v563_v36 = vsub.f32 %v2276_v9, %v2354_v26 }
 0x130   : > { %v1746_v3 = vpop.eup %1745  ;;  %v608_v42 = vmul.f32 %v1744_v37, %v560_v28  ;;  %v566_v9 = vsub.f32 %v2279_v10, %v2358_v29 }
 0x131   : > { %v548_v44 = vsub.f32 %v516_v40, %v532_v38  ;;  %v547_v45 = vsub.f32 %v515_v41, %v531_v39  ;;  %v607_v46 = vmul.f32 %v1746_v3, %v559_v27 }
 0x132   : > { %v494_v53 = vpop.xlane.xlu1 %493  ;;  %v492_v54 = vpop.xlane.xlu0 %491  ;;  %v631_v0 = vmul.f32 %v2369_v1, %v608_v42 }
 0x133   : > { %v1748_v51 = vpop.eup %1747  ;;  %v580_v55 = vadd.f32 1e-05, %v548_v44  ;;  %v579_v56 = vadd.f32 1e-05, %v547_v45  ;;  %v518_v57 = vmul.f32 0.0078125, %v494_v53  ;;  %v517_v58 = vmul.f32 0.0078125, %v492_v54 }
 0x134   : > { %v1750_v59 = vpop.eup %1749  ;;  %v630_v60 = vmul.f32 %v2369_v1, %v607_v46  ;;  %v654_v2 = vadd.f32 %v2376_v47, %v631_v0  ;;  %v610_v52 = vmul.f32 %v1748_v51, %v562_v48  ;;  %v565_v48 = vsub.f32 %v2282_v11, %v2360_v30 }
 0x135   : > { %1751 = vrsqrt.f32 %v580_v55  ;;  %v550_v61 = vsub.f32 %v518_v57, %v534_v49  ;;  %v549_v62 = vsub.f32 %v517_v58, %v533_v50  ;;  %v609_v63 = vmul.f32 %v1750_v59, %v561_v43 }
 0x136   : > { %1753 = vrsqrt.f32 %v579_v56  ;;  %v433_v4 = vpop.xlane.xlu1 %432  ;;  %v431_v5 = vpop.xlane.xlu0 %430  ;;  %v653_v6 = vadd.f32 %v2376_v47, %v630_v60  ;;  %v633_v7 = vmul.f32 %v2369_v1, %v610_v52 }
 0x137   : > { %v582_v12 = vadd.f32 1e-05, %v550_v61  ;;  %v581_v13 = vadd.f32 1e-05, %v549_v62  ;;  %v632_v15 = vmul.f32 %v2369_v1, %v609_v63  ;;  %v2392_v24 = vmul.f32 0.0078125, %v433_v4 }
 0x138   : > { %v669_v14 = vpack.c.bf16 %v654_v2, %v653_v6  ;;  %v656_v16 = vadd.f32 %v2376_v47, %v633_v7  ;;  %v2394_v27 = vmul.f32 0.0078125, %v431_v5 }
 0x139   : > { %1755 = vrsqrt.f32 %v582_v12  ;;  %v655_v21 = vadd.f32 %v2376_v47, %v632_v15  ;;  %v536_v3 = vmul.f32 %v2392_v24, %v2392_v24 }
 0x13a   : > { %1757 = vrsqrt.f32 %v581_v13  ;;  %1540 = vmatprep.mubr.bf16.mxu0 %v669_v14  ;;  %v437_v17 = vpop.xlane.xlu1 %436  ;;  %v435_v18 = vpop.xlane.xlu0 %434  ;;  %v535_v42 = vmul.f32 %v2394_v27, %v2394_v27 }
 0x13b   : > { %v670_v28 = vpack.c.bf16 %v656_v16, %v655_v21  ;;  %v2400_v37 = vmul.f32 0.0078125, %v437_v17  ;;  %v2402_v38 = vmul.f32 0.0078125, %v435_v18  ;;  %v568_v21 = vsub.f32 %v2297_v19, %v2392_v24 }
 0x13d   : > { %1541 = vmatmul.mubr.bf16.vlgmr.msra.gmra.mrb[0].mxu0 %v670_v28  ;;  %v538_v49 = vmul.f32 %v2400_v37, %v2400_v37  ;;  %v537_v50 = vmul.f32 %v2402_v38, %v2402_v38  ;;  %v567_v28 = vsub.f32 %v2300_v20, %v2394_v27  ;;  %v570_v19 = vsub.f32 %v2305_v22, %v2400_v37 }
 0x13e   : > { %v498_v39 = vpop.xlane.xlu1 %497  ;;  %v496_v40 = vpop.xlane.xlu0 %495  ;;  %v569_v27 = vsub.f32 %v2308_v23, %v2402_v38 }
 0x13f   : > { %v1752_v41 = vpop.eup %1751  ;;  %v520_v43 = vmul.f32 0.0078125, %v498_v39  ;;  %v519_v44 = vmul.f32 0.0078125, %v496_v40 }
 0x140   : > { %v1754_v8 = vpop.eup %1753  ;;  %v612_v25 = vmul.f32 %v1752_v41, %v564_v33 }
 0x141   : > { %v552_v26 = vsub.f32 %v520_v43, %v536_v3  ;;  %v551_v45 = vsub.f32 %v519_v44, %v535_v42  ;;  %v611_v46 = vmul.f32 %v1754_v8, %v563_v36 }
 0x142   : > { %v502_v53 = vpop.xlane.xlu1 %501  ;;  %v500_v54 = vpop.xlane.xlu0 %499  ;;  %v635_v0 = vmul.f32 %v2369_v1, %v612_v25 }
 0x143   : > { %v1756_v51 = vpop.eup %1755  ;;  %v584_v55 = vadd.f32 1e-05, %v552_v26  ;;  %v583_v56 = vadd.f32 1e-05, %v551_v45  ;;  %v522_v10 = vmul.f32 0.0078125, %v502_v53  ;;  %v521_v29 = vmul.f32 0.0078125, %v500_v54 }
 0x144   : > { %v1758_v57 = vpop.eup %1757  ;;  %v634_v58 = vmul.f32 %v2369_v1, %v611_v46  ;;  %v658_v11 = vadd.f32 %v2376_v47, %v635_v0  ;;  %v614_v30 = vmul.f32 %v1756_v51, %v566_v9 }
 0x145   : > { %1759 = vrsqrt.f32 %v584_v55  ;;  %v554_v59 = vsub.f32 %v522_v10, %v538_v49  ;;  %v553_v60 = vsub.f32 %v521_v29, %v537_v50  ;;  %v613_v2 = vmul.f32 %v1758_v57, %v565_v48 }
 0x146   : > { %1761 = vrsqrt.f32 %v583_v56  ;;  %v441_v52 = vpop.xlane.xlu1 %440  ;;  %v439_v61 = vpop.xlane.xlu0 %438  ;;  %v657_v62 = vadd.f32 %v2376_v47, %v634_v58  ;;  %v637_v63 = vmul.f32 %v2369_v1, %v614_v30 }
 0x147   : > { %v586_v4 = vadd.f32 1e-05, %v554_v59  ;;  %v585_v5 = vadd.f32 1e-05, %v553_v60  ;;  %v636_v7 = vmul.f32 %v2369_v1, %v613_v2  ;;  %v460_v16 = vmul.f32 0.0078125, %v441_v52 }
 0x148   : > { %v671_v6 = vpack.c.bf16 %v658_v11, %v657_v62  ;;  %v660_v12 = vadd.f32 %v2376_v47, %v637_v63  ;;  %v459_v17 = vmul.f32 0.0078125, %v439_v61 }
 0x149   : > { %1763 = vrsqrt.f32 %v586_v4  ;;  %v659_v15 = vadd.f32 %v2376_v47, %v636_v7  ;;  %v540_v3 = vmul.f32 %v460_v16, %v460_v16  ;;  %v572_v61 = vsub.f32 %v2321_v31, %v460_v16 }
 0x14a   : > { %1765 = vrsqrt.f32 %v585_v5  ;;  %1544 = vmatprep.mubr.bf16.mxu0 %v671_v6  ;;  %v445_v13 = vpop.xlane.xlu1 %444  ;;  %v443_v14 = vpop.xlane.xlu0 %442  ;;  %v539_v42 = vmul.f32 %v459_v17, %v459_v17  ;;  %v571_v63 = vsub.f32 %v2324_v32, %v459_v17 }
 0x14b   : > { %v672_v18 = vpack.c.bf16 %v660_v12, %v659_v15  ;;  %v2428_v33 = vmul.f32 0.0078125, %v445_v13  ;;  %v2430_v36 = vmul.f32 0.0078125, %v443_v14 }
 0x14d   : > { %1545 = vmatmul.mubr.bf16.gmra.mrb[4].mxu0 %v672_v18  ;;  %v542_v26 = vmul.f32 %v2428_v33, %v2428_v33  ;;  %v541_v45 = vmul.f32 %v2430_v36, %v2430_v36  ;;  %v574_v7 = vsub.f32 %v2329_v34, %v2428_v33  ;;  %v573_v14 = vsub.f32 %v2332_v35, %v2430_v36  ;;  %v1732_v36 = vld [vmem:[#allocation7 + $0x28] sm:$0xff]  }
 0x14e   : > { %v506_v39 = vpop.xlane.xlu1 %505  ;;  %v504_v40 = vpop.xlane.xlu0 %503  ;;  %1566 = vmatprep.subr.bf16.mxu1 %v1732_v36 }
 0x14f   : > { %v1760_v41 = vpop.eup %1759  ;;  %v524_v43 = vmul.f32 0.0078125, %v506_v39  ;;  %v523_v44 = vmul.f32 0.0078125, %v504_v40  ;;  %1567 = vmatpush3.bf16.msra.mxu1 %v1732_v36  ;;  %v1733_v40 = vld [vmem:[#allocation7 + $0x30] sm:$0xff]  }
 0x150   : > { %v1762_v8 = vpop.eup %1761  ;;  %v616_v25 = vmul.f32 %v1760_v41, %v568_v21  ;;  %1568 = vmatprep.subr.bf16.mxu1 %v1733_v40  ;;  %v1734_v41 = vld [vmem:[#allocation7 + $0x38] sm:$0xff]  }
 0x151   : > { %v556_v24 = vsub.f32 %v524_v43, %v540_v3  ;;  %v555_v9 = vsub.f32 %v523_v44, %v539_v42  ;;  %v615_v20 = vmul.f32 %v1762_v8, %v567_v28  ;;  %v1735_v3 = vld [vmem:[#allocation8] sm:$0xff]   ;;  %v1736_v42 = vld [vmem:[#allocation8 + $0x8] sm:$0xff]  }
 0x152   : > { %v510_v46 = vpop.xlane.xlu1 %509  ;;  %v508_v48 = vpop.xlane.xlu0 %507  ;;  %v639_v49 = vmul.f32 %v2369_v1, %v616_v25  ;;  %1588 = vmatprep.subr.bf16.mxu0 %v1735_v3  ;;  %v1739_v43 = vld [vmem:[#allocation8 + $0x20] sm:$0xff]  }
 0x153   : > { %v1764_v50 = vpop.eup %1763  ;;  %v588_v53 = vadd.f32 1e-05, %v556_v24  ;;  %v587_v54 = vadd.f32 1e-05, %v555_v9  ;;  %v526_v22 = vmul.f32 0.0078125, %v510_v46  ;;  %v525_v37 = vmul.f32 0.0078125, %v508_v48  ;;  %1569 = vmatpush3.bf16.msra.mxu1 %v1733_v40  ;;  %1589 = vmatpush3.bf16.msra.mxu0 %v1735_v3 }
 0x154   : > { %v1766_v0 = vpop.eup %1765  ;;  %v638_v51 = vmul.f32 %v2369_v1, %v615_v20  ;;  %v662_v23 = vadd.f32 %v2376_v47, %v639_v49  ;;  %v618_v38 = vmul.f32 %v1764_v50, %v570_v19  ;;  %1570 = vmatprep.subr.bf16.mxu1 %v1734_v41  ;;  %1590 = vmatprep.subr.bf16.mxu0 %v1736_v42  ;;  %v2465_v44 = vld [vmem:[%s2582_s4] ss:$0 sm:$0xff] }
 0x155   : > { %1767 = vrsqrt.f32 %v588_v53  ;;  %v558_v55 = vsub.f32 %v526_v22, %v542_v26  ;;  %v557_v56 = vsub.f32 %v525_v37, %v541_v45  ;;  %v617_v10 = vmul.f32 %v1766_v0, %v569_v27 }
 0x156   : > { %1769 = vrsqrt.f32 %v587_v54  ;;  %v661_v29 = vadd.f32 %v2376_v47, %v638_v51  ;;  %v641_v57 = vmul.f32 %v2369_v1, %v618_v38 }
 0x157   : > { %v590_v58 = vadd.f32 1e-05, %v558_v55  ;;  %v589_v11 = vadd.f32 1e-05, %v557_v56  ;;  %v640_v30 = vmul.f32 %v2369_v1, %v617_v10  ;;  %1571 = vmatpush3.bf16.msra.mxu1 %v1734_v41  ;;  %1591 = vmatpush3.bf16.msra.mxu0 %v1736_v42 }
 0x158   : > { %v673_v59 = vpack.c.bf16 %v662_v23, %v661_v29  ;;  %v664_v60 = vadd.f32 %v2376_v47, %v641_v57  ;;  %1620 = vmatprep.subr.bf16.mxu1 %v1735_v3 }
 0x159   : > { %1771 = vrsqrt.f32 %v590_v58  ;;  %v663_v2 = vadd.f32 %v2376_v47, %v640_v30 }
 0x15a   : > { %1773 = vrsqrt.f32 %v589_v11  ;;  %1548 = vmatprep.mubr.bf16.mxu0 %v673_v59 }
 0x15b   : > { %v674_v52 = vpack.c.bf16 %v664_v60, %v663_v2 }
 0x15d   : > { %1549 = vmatmul.mubr.bf16.gmra.mrb[8].mxu0 %v674_v52 }
 0x15f   : > { %v1768_v62 = vpop.eup %1767 }
 0x160   : > { %v1770_v4 = vpop.eup %1769  ;;  %v620_v5 = vmul.f32 %v1768_v62, %v572_v61 }
 0x161   : > { %v619_v6 = vmul.f32 %v1770_v4, %v571_v63 }
 0x162   : > { %v643_v12 = vmul.f32 %v2369_v1, %v620_v5 }
 0x163   : > { %v1772_v13 = vpop.eup %1771  ;;  %v642_v15 = vmul.f32 %v2369_v1, %v619_v6 }
 0x164   : > { %v1774_v18 = vpop.eup %1773  ;;  %v666_v31 = vadd.f32 %v2376_v47, %v643_v12  ;;  %v622_v16 = vmul.f32 %v1772_v13, %v574_v7 }
 0x165   : > { %v665_v32 = vadd.f32 %v2376_v47, %v642_v15  ;;  %v621_v17 = vmul.f32 %v1774_v18, %v573_v14 }
 0x166   : > { %v645_v21 = vmul.f32 %v2369_v1, %v622_v16 }
 0x167   : > { %v675_v28 = vpack.c.bf16 %v666_v31, %v665_v32  ;;  %v644_v34 = vmul.f32 %v2369_v1, %v621_v17  ;;  %v1737_v1 = vld [vmem:[#allocation8 + $0x10] sm:$0xff]  }
 0x168   : > { %v668_v33 = vadd.f32 %v2376_v47, %v645_v21  ;;  %1592 = vmatprep.subr.bf16.mxu0 %v1737_v1 }
 0x169   : > { %1552 = vmatprep.mubr.bf16.mxu0 %v675_v28  ;;  %v667_v39 = vadd.f32 %v2376_v47, %v644_v34  ;;  %v1738_v47 = vld [vmem:[#allocation8 + $0x18] sm:$0xff]   ;;  %1593 = vmatpush3.bf16.msra.mxu0 %v1737_v1 }
 0x16a   : > { %1594 = vmatprep.subr.bf16.mxu0 %v1738_v47 }
 0x16b   : > { %v676_v35 = vpack.c.bf16 %v668_v33, %v667_v39 }
 0x16d   : > { %1553 = vmatmul.mubr.bf16.gmra.mrb[12].mxu0 %v676_v35 }
 0x16e   : > { %1595 = vmatpush3.bf16.msra.mxu0 %v1738_v47 }
 0x16f   : > { %1596 = vmatprep.subr.bf16.mxu0 %v1739_v43 }
 0x172   : > { %1597 = vmatpush3.bf16.msra.mxu0 %v1739_v43 }
 0x210   : > { %v1542_v8 = vpop.f32.mrb[0].mxu0 }
 0x211   : > { %v791_v25 = vadd.f32 %v1542_v8, %v2465_v44  ;;  %v782_v19 = vpop.f32.mrb[1].mxu0 }
 0x212   : > { %v783_v24 = vadd.f32 %v2465_v44, %v782_v19  ;;  %v1543_v9 = vpop.f32.mrb[2].mxu0 }
 0x213   : > { %v863_v20 = vmul.f32 0.01, %v791_v25  ;;  %v794_v27 = vadd.f32 %v1543_v9, %v2465_v44  ;;  %v785_v26 = vpop.f32.mrb[3].mxu0  ;;  %vm847_vm0 = vcmp.gt.f32.partialorder %v791_v25, 0.0 }
 0x214   : > { %v861_v45 = vmul.f32 0.01, %v783_v24  ;;  %v786_v46 = vadd.f32 %v2465_v44, %v785_v26  ;;  %vm845_vm2 = vcmp.gt.f32.partialorder %v783_v24, 0.0 }
 0x215   : > { %vm848_vm1 = vcmp.gt.f32.partialorder %v794_v27, 0.0  ;;  %v864_v48 = vmul.f32 0.01, %v794_v27  ;;  %v879_v50 = vsel %vm847_vm0, %v791_v25, %v863_v20 }
 0x216   : > { %v862_v49 = vmul.f32 0.01, %v786_v46  ;;  %vm846_vm3 = vcmp.gt.f32.partialorder %v786_v46, 0.0  ;;  %v877_v54 = vsel %vm845_vm2, %v783_v24, %v861_v45 }
 0x217   : > { %v880_v53 = vsel %vm848_vm1, %v794_v27, %v864_v48  ;;  %v1741_v48 = vld [vmem:[#allocation8 + $0x30] sm:$0xff]  }
 0x218   : > { %v878_v22 = vsel %vm846_vm3, %v786_v46, %v862_v49  ;;  %v894_v37 = vpack.c.bf16 %v880_v53, %v879_v50  ;;  %v1740_v46 = vld [vmem:[#allocation8 + $0x28] sm:$0xff]   ;;  %v2486_v49 = vld [vmem:[%s2584_s6] ss:$0 sm:$0xff] }
 0x219   : > { %v893_v0 = vpack.c.bf16 %v878_v22, %v877_v54  ;;  %1598 = vmatprep.subr.bf16.mxu0 %v1740_v46 }
 0x21a   : > { %1599 = vmatpush3.bf16.msra.mxu0 %v1740_v46 }
 0x21b   : > { %1572 = vmatprep.mubr.bf16.mxu1 %v893_v0  ;;  %1600 = vmatprep.subr.bf16.mxu0 %v1741_v48 }
 0x21c   : > { %1573 = vmatmul.mubr.bf16.vlgmr.msra.gmra.mrb[0].mxu1 %v894_v37 }
 0x21d   : > { %1628 = vmatpush3.bf16.msra.mxu1 %v1735_v3 }
 0x21e   : > { %1621 = vmatprep.subr.bf16.mxu1 %v1736_v42  ;;  %1601 = vmatpush3.bf16.msra.mxu0 %v1741_v48 }
 0x220   : > { %v1546_v51 = vpop.f32.mrb[4].mxu0 }
 0x221   : > { %v807_v23 = vadd.f32 %v1546_v51, %v2465_v44  ;;  %v798_v38 = vpop.f32.mrb[5].mxu0  ;;  %1629 = vmatpush3.bf16.msra.mxu1 %v1736_v42 }
 0x222   : > { %v799_v55 = vadd.f32 %v2465_v44, %v798_v38  ;;  %v1547_v56 = vpop.f32.mrb[6].mxu0  ;;  %1622 = vmatprep.subr.bf16.mxu1 %v1737_v1 }
 0x223   : > { %v867_v10 = vmul.f32 0.01, %v807_v23  ;;  %v810_v29 = vadd.f32 %v1547_v56, %v2465_v44  ;;  %v801_v57 = vpop.f32.mrb[7].mxu0  ;;  %vm851_vm4 = vcmp.gt.f32.partialorder %v807_v23, 0.0 }
 0x224   : > { %v865_v58 = vmul.f32 0.01, %v799_v55  ;;  %v802_v11 = vadd.f32 %v2465_v44, %v801_v57  ;;  %vm849_vm5 = vcmp.gt.f32.partialorder %v799_v55, 0.0 }
 0x225   : > { %vm852_vm6 = vcmp.gt.f32.partialorder %v810_v29, 0.0  ;;  %v868_v30 = vmul.f32 0.01, %v810_v29  ;;  %1630 = vmatpush3.bf16.msra.mxu1 %v1737_v1  ;;  %v883_v60 = vsel %vm851_vm4, %v807_v23, %v867_v10 }
 0x226   : > { %vm850_vm7 = vcmp.gt.f32.partialorder %v802_v11, 0.0  ;;  %v866_v59 = vmul.f32 0.01, %v802_v11  ;;  %1623 = vmatprep.subr.bf16.mxu1 %v1738_v47  ;;  %v881_v52 = vsel %vm849_vm5, %v799_v55, %v865_v58 }
 0x227   : > { %v884_v2 = vsel %vm852_vm6, %v810_v29, %v868_v30 }
 0x228   : > { %v882_v61 = vsel %vm850_vm7, %v802_v11, %v866_v59  ;;  %v896_v62 = vpack.c.bf16 %v884_v2, %v883_v60 }
 0x229   : > { %v895_v63 = vpack.c.bf16 %v882_v61, %v881_v52  ;;  %1631 = vmatpush3.bf16.msra.mxu1 %v1738_v47 }
 0x22a   : > { %1624 = vmatprep.subr.bf16.mxu1 %v1739_v43 }
 0x22b   : > { %1576 = vmatprep.mubr.bf16.mxu1 %v895_v63 }
 0x22c   : > { %1577 = vmatmul.mubr.bf16.gmra.mrb[4].mxu1 %v896_v62 }
 0x22d   : > { %1632 = vmatpush3.bf16.msra.mxu1 %v1739_v43 }
 0x22e   : > { %1625 = vmatprep.subr.bf16.mxu1 %v1740_v46 }
 0x230   : > { %v1550_v4 = vpop.f32.mrb[8].mxu0 }
 0x231   : > { %v823_v5 = vadd.f32 %v1550_v4, %v2465_v44  ;;  %v814_v6 = vpop.f32.mrb[9].mxu0  ;;  %1633 = vmatpush3.bf16.msra.mxu1 %v1740_v46 }
 0x232   : > { %v815_v7 = vadd.f32 %v2465_v44, %v814_v6  ;;  %v1551_v12 = vpop.f32.mrb[10].mxu0  ;;  %1626 = vmatprep.subr.bf16.mxu1 %v1741_v48 }
 0x233   : > { %v871_v13 = vmul.f32 0.01, %v823_v5  ;;  %v826_v14 = vadd.f32 %v1551_v12, %v2465_v44  ;;  %v817_v15 = vpop.f32.mrb[11].mxu0  ;;  %vm855_vm8 = vcmp.gt.f32.partialorder %v823_v5, 0.0 }
 0x234   : > { %v869_v18 = vmul.f32 0.01, %v815_v7  ;;  %v818_v31 = vadd.f32 %v2465_v44, %v817_v15  ;;  %vm853_vm9 = vcmp.gt.f32.partialorder %v815_v7, 0.0 }
 0x235   : > { %vm856_vm10 = vcmp.gt.f32.partialorder %v826_v14, 0.0  ;;  %v872_v16 = vmul.f32 0.01, %v826_v14  ;;  %v887_v17 = vsel %vm855_vm8, %v823_v5, %v871_v13  ;;  %1634 = vmatpush3.bf16.msra.mxu1 %v1741_v48 }
 0x236   : > { %vm854_vm11 = vcmp.gt.f32.partialorder %v818_v31, 0.0  ;;  %v870_v32 = vmul.f32 0.01, %v818_v31  ;;  %v885_v28 = vsel %vm853_vm9, %v815_v7, %v869_v18 }
 0x237   : > { %v888_v21 = vsel %vm856_vm10, %v826_v14, %v872_v16 }
 0x238   : > { %v886_v34 = vsel %vm854_vm11, %v818_v31, %v870_v32  ;;  %v898_v33 = vpack.c.bf16 %v888_v21, %v887_v17 }
 0x239   : > { %v897_v39 = vpack.c.bf16 %v886_v34, %v885_v28 }
 0x23b   : > { %1580 = vmatprep.mubr.bf16.mxu1 %v897_v39 }
 0x23c   : > { %1581 = vmatmul.mubr.bf16.gmra.mrb[8].mxu1 %v898_v33 }
 0x240   : > { %v1554_v35 = vpop.f32.mrb[12].mxu0 }
 0x241   : > { %v839_v36 = vadd.f32 %v1554_v35, %v2465_v44  ;;  %v830_v40 = vpop.f32.mrb[13].mxu0 }
 0x242   : > { %v831_v41 = vadd.f32 %v2465_v44, %v830_v40  ;;  %v1555_v3 = vpop.f32.mrb[14].mxu0 }
 0x243   : > { %v875_v42 = vmul.f32 0.01, %v839_v36  ;;  %v842_v1 = vadd.f32 %v1555_v3, %v2465_v44  ;;  %v833_v47 = vpop.f32.mrb[15].mxu0  ;;  %vm859_vm12 = vcmp.gt.f32.partialorder %v839_v36, 0.0 }
 0x244   : > { %v873_v43 = vmul.f32 0.01, %v831_v41  ;;  %v834_v8 = vadd.f32 %v2465_v44, %v833_v47  ;;  %vm857_vm13 = vcmp.gt.f32.partialorder %v831_v41, 0.0  ;;  %v1742_v44 = vld [vmem:[#allocation8 + $0x38] sm:$0xff]  }
 0x245   : > { %vm860_vm14 = vcmp.gt.f32.partialorder %v842_v1, 0.0  ;;  %v876_v25 = vmul.f32 0.01, %v842_v1  ;;  %v891_v24 = vsel %vm859_vm12, %v839_v36, %v875_v42  ;;  %1602 = vmatprep.subr.bf16.mxu0 %v1742_v44  ;;  %1627 = vmatprep.subr.bf16.mxu1 %v1742_v44 }
 0x246   : > { %vm858_vm15 = vcmp.gt.f32.partialorder %v834_v8, 0.0  ;;  %v874_v19 = vmul.f32 0.01, %v834_v8  ;;  %v889_v20 = vsel %vm857_vm13, %v831_v41, %v873_v43  ;;  %1603 = vmatpush3.bf16.msra.mxu0 %v1742_v44  ;;  %1635 = vmatpush3.bf16.msra.mxu1 %v1742_v44 }
 0x247   : > { %v892_v9 = vsel %vm860_vm14, %v842_v1, %v876_v25 }
 0x248   : > { %v890_v27 = vsel %vm858_vm15, %v834_v8, %v874_v19  ;;  %v900_v26 = vpack.c.bf16 %v892_v9, %v891_v24 }
 0x249   : > { %v899_v45 = vpack.c.bf16 %v890_v27, %v889_v20 }
 0x24b   : > { %1584 = vmatprep.mubr.bf16.mxu1 %v899_v45 }
 0x24c   : > { %1585 = vmatmul.mubr.bf16.gmra.mrb[12].mxu1 %v900_v26 }
 0x2ef   : > { %v1574_v50 = vpop.f32.mrb[0].mxu1 }
 0x2f0   : > { %v1015_v53 = vadd.f32 %v1574_v50, %v2486_v49  ;;  %v1006_v54 = vpop.f32.mrb[1].mxu1 }
 0x2f1   : > { %v1007_v22 = vadd.f32 %v2486_v49, %v1006_v54  ;;  %v1575_v37 = vpop.f32.mrb[2].mxu1 }
 0x2f2   : > { %v1087_v0 = vmul.f32 0.01, %v1015_v53  ;;  %v1018_v51 = vadd.f32 %v1575_v37, %v2486_v49  ;;  %v1009_v23 = vpop.f32.mrb[3].mxu1  ;;  %vm1071_vm0 = vcmp.gt.f32.partialorder %v1015_v53, 0.0 }
 0x2f3   : > { %v1085_v38 = vmul.f32 0.01, %v1007_v22  ;;  %v1010_v55 = vadd.f32 %v2486_v49, %v1009_v23  ;;  %vm1069_vm1 = vcmp.gt.f32.partialorder %v1007_v22, 0.0 }
 0x2f4   : > { %vm1072_vm2 = vcmp.gt.f32.partialorder %v1018_v51, 0.0  ;;  %v1088_v56 = vmul.f32 0.01, %v1018_v51  ;;  %v1103_v29 = vsel %vm1071_vm0, %v1015_v53, %v1087_v0 }
 0x2f5   : > { %vm1070_vm3 = vcmp.gt.f32.partialorder %v1010_v55, 0.0  ;;  %v1086_v10 = vmul.f32 0.01, %v1010_v55  ;;  %v1101_v11 = vsel %vm1069_vm1, %v1007_v22, %v1085_v38 }
 0x2f6   : > { %v1104_v57 = vsel %vm1072_vm2, %v1018_v51, %v1088_v56 }
 0x2f7   : > { %v1118_v58 = vpack.c.bf16 %v1104_v57, %v1103_v29  ;;  %v1102_v30 = vsel %vm1070_vm3, %v1010_v55, %v1086_v10  ;;  %v1460_v55 = vld [vmem:[%s2586_s8] ss:$0 sm:$0xff] }
 0x2f8   : > { %v1117_v59 = vpack.c.bf16 %v1102_v30, %v1101_v11 }
 0x2fa   : > { %1604 = vmatprep.mubr.bf16.mxu0 %v1117_v59 }
 0x2fb   : > { %1605 = vmatmul.mubr.bf16.vlgmr.msra.gmra.mrb[16].mxu0 %v1118_v58 }
 0x2ff   : > { %v1578_v60 = vpop.f32.mrb[4].mxu1 }
 0x300   : > { %v1031_v2 = vadd.f32 %v1578_v60, %v2486_v49  ;;  %v1022_v52 = vpop.f32.mrb[5].mxu1 }
 0x301   : > { %v1023_v61 = vadd.f32 %v2486_v49, %v1022_v52  ;;  %v1579_v62 = vpop.f32.mrb[6].mxu1 }
 0x302   : > { %v1091_v63 = vmul.f32 0.01, %v1031_v2  ;;  %v1034_v4 = vadd.f32 %v1579_v62, %v2486_v49  ;;  %v1025_v5 = vpop.f32.mrb[7].mxu1  ;;  %vm1075_vm4 = vcmp.gt.f32.partialorder %v1031_v2, 0.0 }
 0x303   : > { %v1089_v6 = vmul.f32 0.01, %v1023_v61  ;;  %v1026_v7 = vadd.f32 %v2486_v49, %v1025_v5  ;;  %vm1073_vm5 = vcmp.gt.f32.partialorder %v1023_v61, 0.0 }
 0x304   : > { %vm1076_vm6 = vcmp.gt.f32.partialorder %v1034_v4, 0.0  ;;  %v1092_v12 = vmul.f32 0.01, %v1034_v4  ;;  %v1107_v14 = vsel %vm1075_vm4, %v1031_v2, %v1091_v63 }
 0x305   : > { %vm1074_vm7 = vcmp.gt.f32.partialorder %v1026_v7, 0.0  ;;  %v1090_v13 = vmul.f32 0.01, %v1026_v7  ;;  %v1105_v18 = vsel %vm1073_vm5, %v1023_v61, %v1089_v6 }
 0x306   : > { %v1108_v15 = vsel %vm1076_vm6, %v1034_v4, %v1092_v12 }
 0x307   : > { %v1106_v31 = vsel %vm1074_vm7, %v1026_v7, %v1090_v13  ;;  %v1120_v16 = vpack.c.bf16 %v1108_v15, %v1107_v14 }
 0x308   : > { %v1119_v32 = vpack.c.bf16 %v1106_v31, %v1105_v18 }
 0x30a   : > { %1608 = vmatprep.mubr.bf16.mxu0 %v1119_v32 }
 0x30b   : > { %1609 = vmatmul.mubr.bf16.gmra.mrb[20].mxu0 %v1120_v16 }
 0x30f   : > { %v1582_v17 = vpop.f32.mrb[8].mxu1 }
 0x310   : > { %v1047_v21 = vadd.f32 %v1582_v17, %v2486_v49  ;;  %v1038_v28 = vpop.f32.mrb[9].mxu1 }
 0x311   : > { %v1039_v34 = vadd.f32 %v2486_v49, %v1038_v28  ;;  %v1583_v33 = vpop.f32.mrb[10].mxu1 }
 0x312   : > { %v1095_v39 = vmul.f32 0.01, %v1047_v21  ;;  %v1050_v35 = vadd.f32 %v1583_v33, %v2486_v49  ;;  %v1041_v36 = vpop.f32.mrb[11].mxu1  ;;  %vm1079_vm8 = vcmp.gt.f32.partialorder %v1047_v21, 0.0 }
 0x313   : > { %v1093_v40 = vmul.f32 0.01, %v1039_v34  ;;  %v1042_v41 = vadd.f32 %v2486_v49, %v1041_v36  ;;  %vm1077_vm9 = vcmp.gt.f32.partialorder %v1039_v34, 0.0 }
 0x314   : > { %vm1080_vm10 = vcmp.gt.f32.partialorder %v1050_v35, 0.0  ;;  %v1096_v3 = vmul.f32 0.01, %v1050_v35  ;;  %v1111_v1 = vsel %vm1079_vm8, %v1047_v21, %v1095_v39 }
 0x315   : > { %vm1078_vm11 = vcmp.gt.f32.partialorder %v1042_v41, 0.0  ;;  %v1094_v42 = vmul.f32 0.01, %v1042_v41  ;;  %v1109_v8 = vsel %vm1077_vm9, %v1039_v34, %v1093_v40 }
 0x316   : > { %v1112_v47 = vsel %vm1080_vm10, %v1050_v35, %v1096_v3 }
 0x317   : > { %v1122_v43 = vpack.c.bf16 %v1112_v47, %v1111_v1  ;;  %v1110_v25 = vsel %vm1078_vm11, %v1042_v41, %v1094_v42 }
 0x318   : > { %v1121_v19 = vpack.c.bf16 %v1110_v25, %v1109_v8 }
 0x31a   : > { %1612 = vmatprep.mubr.bf16.mxu1 %v1121_v19 }
 0x31b   : > { %1613 = vmatmul.mubr.bf16.vlgmr.msra.gmra.mrb[16].mxu1 %v1122_v43 }
 0x31f   : > { %v1586_v24 = vpop.f32.mrb[12].mxu1 }
 0x320   : > { %v1063_v9 = vadd.f32 %v1586_v24, %v2486_v49  ;;  %v1054_v20 = vpop.f32.mrb[13].mxu1 }
 0x321   : > { %v1055_v27 = vadd.f32 %v2486_v49, %v1054_v20  ;;  %v1587_v26 = vpop.f32.mrb[14].mxu1 }
 0x322   : > { %v1099_v45 = vmul.f32 0.01, %v1063_v9  ;;  %v1066_v46 = vadd.f32 %v1587_v26, %v2486_v49  ;;  %v1057_v48 = vpop.f32.mrb[15].mxu1  ;;  %vm1083_vm12 = vcmp.gt.f32.partialorder %v1063_v9, 0.0 }
 0x323   : > { %v1097_v44 = vmul.f32 0.01, %v1055_v27  ;;  %v1058_v50 = vadd.f32 %v2486_v49, %v1057_v48  ;;  %vm1081_vm13 = vcmp.gt.f32.partialorder %v1055_v27, 0.0 }
 0x324   : > { %vm1084_vm14 = vcmp.gt.f32.partialorder %v1066_v46, 0.0  ;;  %v1100_v53 = vmul.f32 0.01, %v1066_v46  ;;  %v1115_v22 = vsel %vm1083_vm12, %v1063_v9, %v1099_v45 }
 0x325   : > { %vm1082_vm15 = vcmp.gt.f32.partialorder %v1058_v50, 0.0  ;;  %v1098_v54 = vmul.f32 0.01, %v1058_v50  ;;  %v1113_v0 = vsel %vm1081_vm13, %v1055_v27, %v1097_v44 }
 0x326   : > { %v1116_v37 = vsel %vm1084_vm14, %v1066_v46, %v1100_v53 }
 0x327   : > { %v1114_v51 = vsel %vm1082_vm15, %v1058_v50, %v1098_v54  ;;  %v1124_v23 = vpack.c.bf16 %v1116_v37, %v1115_v22 }
 0x328   : > { %v1123_v38 = vpack.c.bf16 %v1114_v51, %v1113_v0 }
 0x32a   : > { %1616 = vmatprep.mubr.bf16.mxu1 %v1123_v38 }
 0x32b   : > { %1617 = vmatmul.mubr.bf16.gmra.mrb[20].mxu1 %v1124_v23 }
 0x3ce   : > { %v1606_v56 = vpop.f32.mrb[16].mxu0 }
 0x3cf   : > { %v1239_v49 = vadd.f32 %v1606_v56, %v1460_v55  ;;  %v1230_v10 = vpop.f32.mrb[17].mxu0 }
 0x3d0   : > { %v1231_v29 = vadd.f32 %v1460_v55, %v1230_v10  ;;  %v1607_v57 = vpop.f32.mrb[18].mxu0 }
 0x3d1   : > { %1295 = vst [vmem:[%s2509_s30 + $0x10] sm:$0xff] %v1239_v49  ;;  %v1242_v58 = vadd.f32 %v1607_v57, %v1460_v55  ;;  %v1233_v11 = vpop.f32.mrb[19].mxu0 }
 0x3d2   : > { %1293 = vst [vmem:[%s2509_s30] sm:$0xff] %v1231_v29  ;;  %v1234_v30 = vadd.f32 %v1460_v55, %v1233_v11 }
 0x3d3   : > { %1296 = vst [vmem:[%s2509_s30 + $0x18] sm:$0xff] %v1242_v58 }
 0x3d4   : > { %1294 = vst [vmem:[%s2509_s30 + $0x8] sm:$0xff] %v1234_v30 }
 0x3de   : > { %v1610_v59 = vpop.f32.mrb[20].mxu0 }
 0x3df   : > { %v1255_v60 = vadd.f32 %v1610_v59, %v1460_v55  ;;  %v1246_v2 = vpop.f32.mrb[21].mxu0 }
 0x3e0   : > { %v1247_v52 = vadd.f32 %v1460_v55, %v1246_v2  ;;  %v1611_v61 = vpop.f32.mrb[22].mxu0 }
 0x3e1   : > { %1299 = vst [vmem:[%s2509_s30 + $0x30] sm:$0xff] %v1255_v60  ;;  %v1258_v62 = vadd.f32 %v1611_v61, %v1460_v55  ;;  %v1249_v63 = vpop.f32.mrb[23].mxu0 }
 0x3e2   : > { %1297 = vst [vmem:[%s2509_s30 + $0x20] sm:$0xff] %v1247_v52  ;;  %v1250_v4 = vadd.f32 %v1460_v55, %v1249_v63 }
 0x3e3   : > { %1300 = vst [vmem:[%s2509_s30 + $0x38] sm:$0xff] %v1258_v62 }
 0x3e4   : > { %1298 = vst [vmem:[%s2509_s30 + $0x28] sm:$0xff] %v1250_v4 }
 0x3ee   : > { %v1614_v5 = vpop.f32.mrb[16].mxu1 }
 0x3ef   : > { %v1271_v6 = vadd.f32 %v1614_v5, %v1460_v55  ;;  %v1262_v7 = vpop.f32.mrb[17].mxu1 }
 0x3f0   : > { %v1263_v12 = vadd.f32 %v1460_v55, %v1262_v7  ;;  %v1615_v13 = vpop.f32.mrb[18].mxu1 }
 0x3f1   : > { %1303 = vst [vmem:[%s2509_s30 + $0x50] sm:$0xff] %v1271_v6  ;;  %v1274_v14 = vadd.f32 %v1615_v13, %v1460_v55  ;;  %v1265_v15 = vpop.f32.mrb[19].mxu1 }
 0x3f2   : > { %1301 = vst [vmem:[%s2509_s30 + $0x40] sm:$0xff] %v1263_v12  ;;  %v1266_v18 = vadd.f32 %v1460_v55, %v1265_v15 }
 0x3f3   : > { %1304 = vst [vmem:[%s2509_s30 + $0x58] sm:$0xff] %v1274_v14 }
 0x3f4   : > { %1302 = vst [vmem:[%s2509_s30 + $0x48] sm:$0xff] %v1266_v18 }
 0x3fe   : > { %v1618_v31 = vpop.f32.mrb[20].mxu1 }
 0x3ff   : > { %v1287_v16 = vadd.f32 %v1618_v31, %v1460_v55  ;;  %v1278_v32 = vpop.f32.mrb[21].mxu1 }
 0x400   : > { %v1279_v17 = vadd.f32 %v1460_v55, %v1278_v32  ;;  %v1619_v21 = vpop.f32.mrb[22].mxu1 }
 0x401   : > { %1307 = vst [vmem:[%s2509_s30 + $0x70] sm:$0xff] %v1287_v16  ;;  %v1290_v28 = vadd.f32 %v1619_v21, %v1460_v55  ;;  %v1281_v34 = vpop.f32.mrb[23].mxu1 }
 0x402   : > { %1305 = vst [vmem:[%s2509_s30 + $0x60] sm:$0xff] %v1279_v17  ;;  %v1282_v33 = vadd.f32 %v1460_v55, %v1281_v34 }
 0x403   : > { %1308 = vst [vmem:[%s2509_s30 + $0x78] sm:$0xff] %v1290_v28 }
 0x404   : > { %1306 = vst [vmem:[%s2509_s30 + $0x68] sm:$0xff] %v1282_v33 }
 0x405   : > { %1902 = shalt.err (!%p1899_p4)
}
 0x406   : > { %s1903_s21 = scalar_lea.hbm %s2529_s18, 2048  ;;  %s1907_s30 = scalar_lea.hbm %s2611_s17, 4096 }
 0x407   : > { %p1904_p9 = scmp.ne.s32.totalorder %s2529_s18, %s1903_s21  ;;  %p1908_p8 = scmp.lt.u32.totalorder %s2529_s18, %s2611_s17 }
 0x408   : > { %p1909_p13 = scmp.lt.u32.totalorder %s1907_s30, %s1903_s21  ;;  %p1911_p10 = scmp.lt.u32.totalorder %s1903_s21, %s2529_s18 }
 0x409   : > { %p1905_p0 = pnand %p1904_p9, %p2180_p5 }
 0x40a   : > { %p1910_p6 = por %p1909_p13, %p1908_p8 }
 0x40b   : > { %p1906_p11 = pneg %p1905_p0 }
 0x40c   : > { %p1912_p3 = por %p1911_p10, %p1910_p6 }
 0x40e   : > { %p1913_p7 = pnand %p1912_p3, %p1906_p11 }
 0x410   : > { %1916 = shalt.err (!%p1913_p7)
}
 0x411   : > { %s1974_s15 = smov 128   ;;  %s1975_s23 = smov 8  }
 0x412   : > { %1650 = dma.vmem_to_hbm [thread:$0]  (%p2180_p5), %s2531_s25, 2048, %s2529_s18, %s1310_s13, %s1974_s15, %s1974_s15, %s1975_s23  }
 0x413 PF: > { %s2612_s19 = sld [smem:[#allocation15_spill]]  ;;  %s2613_s22 = sld [smem:[#allocation16_spill]] }
 0x414   : > { %p2615_p1 = scmp.ge.s32.totalorder %s1963_s12, 2 }
 0x419   : > { %s1338_s26 = sand.u32 1, %s2612_s19   ;;  %p2614_p12 = scmp.ne.s32.totalorder %s2613_s22, 0 }
 0x41a   : > { %s1339_s21 = scalar_lea.sflag [#allocation4], %s1338_s26 }
 0x41b   : > { %p1667_p2 = pnand %p2615_p1, %p2614_p12 }
 0x41d   : > { %1946 = dma.done.wait (!%p1667_p2), %s1339_s21, 2048  }
 0x41e   : > { %1948 = vsyncadd (!%p1667_p2), %s1339_s21, 4294965248  ;;  %p24_p4 = scmp.ge.s32.totalorder %s2166_s14, 4   ;;  %s2616_s30 = smov %s1955_s10 }
 0x41f   : > { %s2617_s10 = smov %s1959_s11  ;;  %s2618_s11 = smov %s2176_s16 }
 0x420   : > { %s2619_s12 = smov %s2166_s14  ;;  %26 = sbr.rel (!%p24_p4) target bundleno = 9 (0x9), region = 113 }
 0x427   :  { %1344 = vsyncpa [#allocation3], 1 }
 0x428   :  { %1346 = vsyncpa [#allocation3 + $0x1], 1 }
 0x429   :  { %1347 = vsyncpa [#allocation6], 1 }
 0x42a   :  { %1348 = vsyncpa [#allocation9], 1 }
 0x42b   :  { %1349 = vsyncpa [#allocation4], 1 }
 0x42c   :  { %1351 = vsyncpa [#allocation4 + $0x1], 1 }

</bundles_post_ra>
